<compile_context>
chip_gen: v6e
topology: v6e:2x2x1
jax: 0.10.0
libtpu: 0.0.40
codegen_flags: <defaults>
</compile_context>

<pallas_src>
import functools

import jax
import jax.numpy as jnp
from jax.experimental import pallas as pl
from jax.experimental.pallas import tpu as pltpu


def _round_up(x, m):
    return ((x + m - 1) // m) * m


def agent_fwd_kernel(action_dim, obs_ref,
                     w1_ref, b1_ref, w2_ref, b2_ref, w3_ref, b3_ref,
                     whead_ref, bhead_ref, wc2_ref, bc2_ref,
                     out_ref):
    f32 = jnp.float32
    relu = lambda x: jnp.maximum(x, 0.0)

    # --- trunk MLP (network[:-1]); Dropout is identity in eval mode ---
    h = relu(jnp.dot(obs_ref[...].astype(w1_ref.dtype), w1_ref[...],
                     preferred_element_type=f32) + b1_ref[...])
    h = relu(jnp.dot(h.astype(w2_ref.dtype), w2_ref[...],
                     preferred_element_type=f32) + b2_ref[...])
    feats = relu(jnp.dot(h.astype(w3_ref.dtype), w3_ref[...],
                         preferred_element_type=f32) + b3_ref[...])

    # --- fused head matmul over `combined` (attention branch folded into bias):
    #     columns [0:A] = action logits, [A:A+64] = confidence hidden pre-activation ---
    head = jnp.dot(feats.astype(whead_ref.dtype), whead_ref[...],
                   preferred_element_type=f32) + bhead_ref[...]

    # --- confidence: VPU multiply + row-reduce instead of an N=1 MXU matmul.
    #     Invariant: wc2 row is exactly zero outside [A, A+64), so relu over the
    #     logit / zero-pad columns cannot leak into the confidence sum. ---
    ch = relu(head)
    conf = jax.nn.sigmoid(
        jnp.sum(ch * wc2_ref[...], axis=-1, keepdims=True) + bc2_ref[...])

    # --- assemble one lane-dense output slab using 1-row masks (no full-tile iota):
    #     [:, :A] = logits, [:, A] = confidence, rest zero ---
    headw = head.shape[-1]
    col = jax.lax.broadcasted_iota(jnp.int32, (1, headw), 1)
    logit_mask = (col < action_dim).astype(f32)     # (1, HEADW)
    conf_mask = (col == action_dim).astype(f32)     # (1, HEADW)
    out_ref[...] = head * logit_mask + conf * conf_mask


@functools.partial(jax.jit, static_argnames=("batch_tile", "weights_dtype"))
def sequential_execution_agent_forward(obs, sup9, params, *, batch_tile=512,
                                       weights_dtype=jnp.float32):
    """obs: (B, obs_dim) f32; sup9: (1, 9) f32 (concatenated superpositions)."""
    B, OBS = obs.shape
    H = params["w1"].shape[1]
    A = params["w4"].shape[1]
    C = params["wc1"].shape[1]          # 64
    HEADW = _round_up(A + C, 128)       # lane-dense fused head / output width
    OBSP = _round_up(OBS, 128)          # lane-dense obs / K for the first matmul

    # --- fold the batch-invariant superposition + single-key attention branch
    #     (attention softmax over one key == 1) into the head biases ---
    sup_feat = sup9 @ params["wsp"] + params["bsp"]                          # (1, H)
    attended = (sup_feat @ params["wv"] + params["bv"]) @ params["wo"] + params["bo"]
    b4_eff = params["b4"] + attended @ params["w4"]                          # (1, A)
    bc1_eff = params["bc1"] + attended @ params["wc1"]                       # (1, C)

    # --- fused, zero-padded head weight / bias / wc2 row ---
    whead = (jnp.zeros((H, HEADW), jnp.float32)
             .at[:, :A].set(params["w4"])
             .at[:, A:A + C].set(params["wc1"]))
    bhead = (jnp.zeros((1, HEADW), jnp.float32)
             .at[:, :A].set(b4_eff)
             .at[:, A:A + C].set(bc1_eff))
    wc2row = jnp.zeros((1, HEADW), jnp.float32).at[:, A:A + C].set(
        params["wc2"].reshape(1, C))
    bc2 = params["bc2"].reshape(1, 1)

    # --- lane-dense obs: pad obs columns / w1 rows with zeros (no effect on results) ---
    w1 = params["w1"]
    if OBSP != OBS:
        w1 = jnp.zeros((OBSP, H), jnp.float32).at[:OBS, :].set(w1)

    # --- resident weights: optionally bf16 to halve DMA/VMEM (v6e/v7x); f32 default ---
    w1 = w1.astype(weights_dtype)
    w2 = params["w2"].astype(weights_dtype)
    w3 = params["w3"].astype(weights_dtype)
    whead_c = whead.astype(weights_dtype)

    # --- batch tiling: big tiles amortize per-step overhead; ensure >=2 grid steps
    #     when B allows so the "parallel" axis actually uses both v7x TensorCores ---
    TB = min(batch_tile, max(8, _round_up(-(-B // 2), 8)))
    B_pad = _round_up(max(B, 1), TB)
    if (B_pad, OBSP) != (B, OBS):
        obs_p = jnp.zeros((B_pad, OBSP), obs.dtype).at[:B, :OBS].set(obs)
    else:
        obs_p = obs

    # --- explicit scoped-VMEM budget: resident weights (double-buffered by default)
    #     + double-buffered obs / output tiles, with headroom ---
    w_isz = jnp.dtype(weights_dtype).itemsize
    resident_bytes = ((w1.size + w2.size + w3.size + whead_c.size) * w_isz
                      + (params["b1"].size + params["b2"].size + params["b3"].size
                         + bhead.size + wc2row.size + bc2.size) * 4)
    stream_bytes = 2 * TB * OBSP * 4 + 2 * TB * HEADW * 4
    need = 2 * resident_bytes + stream_bytes
    vmem_limit = int(min(max(2 * need, 16 << 20), 64 << 20))

    const = lambda shape: pl.BlockSpec(shape, lambda i: (0, 0))
    slab = pl.pallas_call(
        functools.partial(agent_fwd_kernel, A),
        out_shape=jax.ShapeDtypeStruct((B_pad, HEADW), jnp.float32),
        grid=(B_pad // TB,),
        in_specs=[
            pl.BlockSpec((TB, OBSP), lambda i: (i, 0)),
            const((OBSP, H)), const((1, H)),
            const((H, H)), const((1, H)),
            const((H, H)), const((1, H)),
            const((H, HEADW)), const((1, HEADW)),
            const((1, HEADW)), const((1, 1)),
        ],
        out_specs=pl.BlockSpec((TB, HEADW), lambda i: (i, 0)),
        compiler_params=pltpu.CompilerParams(
            dimension_semantics=("parallel",),
            vmem_limit_bytes=vmem_limit),
    )(obs_p, w1, params["b1"], w2, params["b2"], w3, params["b3"],
      whead_c, bhead, wc2row, bc2)

    logits = slab[:B, :A]
    conf = slab[:B, A:A + 1]
    return logits, conf


def _init_params(key, obs_dim, hidden_dim, action_dim):
    """Deterministic synthetic init; weights stored as (in, out)."""
    ks = jax.random.split(key, 20)

    def w(k, i, o, scale=0.1):
        return (scale * jax.random.normal(k, (i, o))).astype(jnp.float32)

    def b(k, o, scale=0.01):
        return (scale * jax.random.normal(k, (1, o))).astype(jnp.float32)

    H = hidden_dim
    return dict(
        w1=w(ks[0], obs_dim, H),  b1=b(ks[1], H),
        w2=w(ks[2], H, H),        b2=b(ks[3], H),
        w3=w(ks[4], H, H),        b3=b(ks[5], H),
        wsp=w(ks[6], 9, H),       bsp=b(ks[7], H),
        wv=w(ks[8], H, H),        bv=b(ks[9], H),      # MHA value in-projection
        wo=w(ks[10], H, H),       bo=b(ks[11], H),     # MHA output projection
        w4=w(ks[12], H, action_dim), b4=b(ks[13], action_dim),
        wc1=w(ks[14], H, 64),     bc1=b(ks[15], 64),
        wc2=w(ks[16], 64, 1),     bc2=b(ks[17], 1),
    )


def _reference_forward(obs, sup9, p):
    """Pure-JAX reference of the same math (for correctness check)."""
    relu = lambda x: jnp.maximum(x, 0.0)
    h = relu(obs @ p["w1"] + p["b1"])
    h = relu(h @ p["w2"] + p["b2"])
    feats = relu(h @ p["w3"] + p["b3"])
    sup_feat = sup9 @ p["wsp"] + p["bsp"]
    attended = (sup_feat @ p["wv"] + p["bv"]) @ p["wo"] + p["bo"]
    combined = feats + attended
    logits = combined @ p["w4"] + p["b4"]
    conf = jax.nn.sigmoid(relu(combined @ p["wc1"] + p["bc1"]) @ p["wc2"] + p["bc2"])
    return logits, conf


if __name__ == "__main__":
    B, OBS, ACT, H = 2, 16, 8, 32   # hidden_dim=32 via config (divisible by num_heads=8)
    key = jax.random.PRNGKey(0)
    k_obs, k_sup, k_par = jax.random.split(key, 3)

    obs = jax.random.normal(k_obs, (B, OBS), dtype=jnp.float32)
    # SuperpositionContext: 3 superposition vectors of length 3 (each a probability
    # simplex), concatenated -> (1, 9)
    sup3 = jax.random.uniform(k_sup, (3, 3), dtype=jnp.float32)
    sup3 = sup3 / jnp.sum(sup3, axis=1, keepdims=True)
    sup9 = sup3.reshape(1, 9)

    params = _init_params(k_par, OBS, H, ACT)

    logits, conf = sequential_execution_agent_forward(obs, sup9, params)
    jax.block_until_ready((logits, conf))

    ref_logits, ref_conf = _reference_forward(obs, sup9, params)
    assert logits.shape == (B, ACT) and conf.shape == (B, 1)
    assert jnp.allclose(logits, ref_logits, atol=1e-5, rtol=1e-5)
    assert jnp.allclose(conf, ref_conf, atol=1e-5, rtol=1e-5)

    # TODO(synk): training-mode Dropout and attention-weight dropout are omitted
    # (eval-mode semantics); with a single key/value position the softmax is exactly 1.
    print("KERNEL_OK")
</pallas_src>

<mosaic_0001>
module attributes {stable_mosaic.version = 11 : i64} {
  func.func @agent_fwd_kernel(%arg0: i32, %arg1: memref<8x128xf32, #tpu.memory_space<vmem>>, %arg2: memref<128x32xf32, #tpu.memory_space<vmem>>, %arg3: memref<1x32xf32, #tpu.memory_space<vmem>>, %arg4: memref<32x32xf32, #tpu.memory_space<vmem>>, %arg5: memref<1x32xf32, #tpu.memory_space<vmem>>, %arg6: memref<32x32xf32, #tpu.memory_space<vmem>>, %arg7: memref<1x32xf32, #tpu.memory_space<vmem>>, %arg8: memref<32x128xf32, #tpu.memory_space<vmem>>, %arg9: memref<1x128xf32, #tpu.memory_space<vmem>>, %arg10: memref<1x128xf32, #tpu.memory_space<vmem>>, %arg11: memref<1x1xf32, #tpu.memory_space<vmem>>, %arg12: memref<8x128xf32, #tpu.memory_space<vmem>>) attributes {dimension_semantics = [#tpu.dimension_semantics<parallel>], iteration_bounds = array<i64: 1>, scalar_prefetch = 0 : i64, scratch_operands = 0 : i64, tpu.core_type = #tpu.core_type<tc>, window_params = [{transform_indices = @transform_0, window_bounds = array<i64: 8, 128>}, {pipeline_mode = #tpu.pipeline_mode<synchronous>, transform_indices = @transform_1, window_bounds = array<i64: 128, 32>}, {pipeline_mode = #tpu.pipeline_mode<synchronous>, transform_indices = @transform_2, window_bounds = array<i64: 1, 32>}, {pipeline_mode = #tpu.pipeline_mode<synchronous>, transform_indices = @transform_3, window_bounds = array<i64: 32, 32>}, {pipeline_mode = #tpu.pipeline_mode<synchronous>, transform_indices = @transform_4, window_bounds = array<i64: 1, 32>}, {pipeline_mode = #tpu.pipeline_mode<synchronous>, transform_indices = @transform_5, window_bounds = array<i64: 32, 32>}, {pipeline_mode = #tpu.pipeline_mode<synchronous>, transform_indices = @transform_6, window_bounds = array<i64: 1, 32>}, {pipeline_mode = #tpu.pipeline_mode<synchronous>, transform_indices = @transform_7, window_bounds = array<i64: 32, 128>}, {pipeline_mode = #tpu.pipeline_mode<synchronous>, transform_indices = @transform_8, window_bounds = array<i64: 1, 128>}, {pipeline_mode = #tpu.pipeline_mode<synchronous>, transform_indices = @transform_9, window_bounds = array<i64: 1, 128>}, {pipeline_mode = #tpu.pipeline_mode<synchronous>, transform_indices = @transform_10, window_bounds = array<i64: 1, 1>}, {transform_indices = @transform_11, window_bounds = array<i64: 8, 128>}]} {
    %c0 = arith.constant 0 : index
    %c0_0 = arith.constant 0 : index
    %0 = vector.load %arg1[%c0, %c0_0] : memref<8x128xf32, #tpu.memory_space<vmem>>, vector<8x128xf32>
    %c0_1 = arith.constant 0 : index
    %c0_2 = arith.constant 0 : index
    %1 = vector.load %arg2[%c0_1, %c0_2] : memref<128x32xf32, #tpu.memory_space<vmem>>, vector<128x32xf32>
    %cst = arith.constant dense<0.000000e+00> : vector<8x32xf32>
    %2 = tpu.matmul %0, %1, %cst {dimension_numbers = #tpu.dot_dimension_numbers<[1], [0], [0], [1], [0, 0, 1, 1], [], []>} : vector<8x128xf32>, vector<128x32xf32>, vector<8x32xf32> -> vector<8x32xf32>
    %c0_3 = arith.constant 0 : index
    %c0_4 = arith.constant 0 : index
    %3 = vector.load %arg3[%c0_3, %c0_4] : memref<1x32xf32, #tpu.memory_space<vmem>>, vector<1x32xf32>
    %4 = vector.broadcast %3 : vector<1x32xf32> to vector<8x32xf32>
    %5 = arith.addf %2, %4 : vector<8x32xf32>
    %cst_5 = arith.constant 0.000000e+00 : f32
    %6 = vector.broadcast %cst_5 : f32 to vector<8x32xf32>
    %7 = arith.maximumf %5, %6 : vector<8x32xf32>
    %c0_6 = arith.constant 0 : index
    %c0_7 = arith.constant 0 : index
    %8 = vector.load %arg4[%c0_6, %c0_7] : memref<32x32xf32, #tpu.memory_space<vmem>>, vector<32x32xf32>
    %cst_8 = arith.constant dense<0.000000e+00> : vector<8x32xf32>
    %9 = tpu.matmul %7, %8, %cst_8 {dimension_numbers = #tpu.dot_dimension_numbers<[1], [0], [0], [1], [0, 0, 1, 1], [], []>} : vector<8x32xf32>, vector<32x32xf32>, vector<8x32xf32> -> vector<8x32xf32>
    %c0_9 = arith.constant 0 : index
    %c0_10 = arith.constant 0 : index
    %10 = vector.load %arg5[%c0_9, %c0_10] : memref<1x32xf32, #tpu.memory_space<vmem>>, vector<1x32xf32>
    %11 = vector.broadcast %10 : vector<1x32xf32> to vector<8x32xf32>
    %12 = arith.addf %9, %11 : vector<8x32xf32>
    %cst_11 = arith.constant 0.000000e+00 : f32
    %13 = vector.broadcast %cst_11 : f32 to vector<8x32xf32>
    %14 = arith.maximumf %12, %13 : vector<8x32xf32>
    %c0_12 = arith.constant 0 : index
    %c0_13 = arith.constant 0 : index
    %15 = vector.load %arg6[%c0_12, %c0_13] : memref<32x32xf32, #tpu.memory_space<vmem>>, vector<32x32xf32>
    %cst_14 = arith.constant dense<0.000000e+00> : vector<8x32xf32>
    %16 = tpu.matmul %14, %15, %cst_14 {dimension_numbers = #tpu.dot_dimension_numbers<[1], [0], [0], [1], [0, 0, 1, 1], [], []>} : vector<8x32xf32>, vector<32x32xf32>, vector<8x32xf32> -> vector<8x32xf32>
    %c0_15 = arith.constant 0 : index
    %c0_16 = arith.constant 0 : index
    %17 = vector.load %arg7[%c0_15, %c0_16] : memref<1x32xf32, #tpu.memory_space<vmem>>, vector<1x32xf32>
    %18 = vector.broadcast %17 : vector<1x32xf32> to vector<8x32xf32>
    %19 = arith.addf %16, %18 : vector<8x32xf32>
    %cst_17 = arith.constant 0.000000e+00 : f32
    %20 = vector.broadcast %cst_17 : f32 to vector<8x32xf32>
    %21 = arith.maximumf %19, %20 : vector<8x32xf32>
    %c0_18 = arith.constant 0 : index
    %c0_19 = arith.constant 0 : index
    %22 = vector.load %arg8[%c0_18, %c0_19] : memref<32x128xf32, #tpu.memory_space<vmem>>, vector<32x128xf32>
    %cst_20 = arith.constant dense<0.000000e+00> : vector<8x128xf32>
    %23 = tpu.matmul %21, %22, %cst_20 {dimension_numbers = #tpu.dot_dimension_numbers<[1], [0], [0], [1], [0, 0, 1, 1], [], []>} : vector<8x32xf32>, vector<32x128xf32>, vector<8x128xf32> -> vector<8x128xf32>
    %c0_21 = arith.constant 0 : index
    %c0_22 = arith.constant 0 : index
    %24 = vector.load %arg9[%c0_21, %c0_22] : memref<1x128xf32, #tpu.memory_space<vmem>>, vector<1x128xf32>
    %25 = vector.broadcast %24 : vector<1x128xf32> to vector<8x128xf32>
    %26 = arith.addf %23, %25 : vector<8x128xf32>
    %cst_23 = arith.constant 0.000000e+00 : f32
    %27 = vector.broadcast %cst_23 : f32 to vector<8x128xf32>
    %28 = arith.maximumf %26, %27 : vector<8x128xf32>
    %c0_24 = arith.constant 0 : index
    %c0_25 = arith.constant 0 : index
    %29 = vector.load %arg10[%c0_24, %c0_25] : memref<1x128xf32, #tpu.memory_space<vmem>>, vector<1x128xf32>
    %30 = vector.broadcast %29 : vector<1x128xf32> to vector<8x128xf32>
    %31 = arith.mulf %28, %30 : vector<8x128xf32>
    %cst_26 = arith.constant dense<0.000000e+00> : vector<8xf32>
    %32 = vector.multi_reduction <add>, %31, %cst_26 [1] : vector<8x128xf32> to vector<8xf32>
    %33 = vector.shape_cast %32 : vector<8xf32> to vector<8x1xf32>
    %c0_27 = arith.constant 0 : index
    %c0_28 = arith.constant 0 : index
    %34 = vector.load %arg11[%c0_27, %c0_28] : memref<1x1xf32, #tpu.memory_space<vmem>>, vector<1x1xf32>
    %35 = vector.broadcast %34 : vector<1x1xf32> to vector<8x1xf32>
    %36 = arith.addf %33, %35 : vector<8x1xf32>
    %37 = arith.negf %36 : vector<8x1xf32>
    %38 = math.exp %37 : vector<8x1xf32>
    %cst_29 = arith.constant 1.000000e+00 : f32
    %39 = vector.broadcast %cst_29 : f32 to vector<8x1xf32>
    %40 = arith.addf %39, %38 : vector<8x1xf32>
    %41 = arith.divf %39, %40 : vector<8x1xf32>
    %42 = tpu.iota {dimensions = array<i32: 1>} : vector<1x128xi32>
    %c8_i32 = arith.constant 8 : i32
    %43 = vector.broadcast %c8_i32 : i32 to vector<1x128xi32>
    %44 = arith.cmpi slt, %42, %43 : vector<1x128xi32>
    %45 = arith.extui %44 : vector<1x128xi1> to vector<1x128xi32>
    %46 = arith.sitofp %45 : vector<1x128xi32> to vector<1x128xf32>
    %c8_i32_30 = arith.constant 8 : i32
    %47 = vector.broadcast %c8_i32_30 : i32 to vector<1x128xi32>
    %48 = arith.cmpi eq, %42, %47 : vector<1x128xi32>
    %49 = arith.extui %48 : vector<1x128xi1> to vector<1x128xi32>
    %50 = arith.sitofp %49 : vector<1x128xi32> to vector<1x128xf32>
    %51 = vector.broadcast %46 : vector<1x128xf32> to vector<8x128xf32>
    %52 = arith.mulf %26, %51 : vector<8x128xf32>
    %53 = vector.broadcast %41 : vector<8x1xf32> to vector<8x128xf32>
    %54 = vector.broadcast %50 : vector<1x128xf32> to vector<8x128xf32>
    %55 = arith.mulf %53, %54 : vector<8x128xf32>
    %56 = arith.addf %52, %55 : vector<8x128xf32>
    %c0_31 = arith.constant 0 : index
    %c0_32 = arith.constant 0 : index
    %57 = vector.load %arg12[%c0_31, %c0_32] : memref<8x128xf32, #tpu.memory_space<vmem>>, vector<8x128xf32>
    tpu.vector_store %arg12[%c0_31, %c0_32], %56 {strides = array<i32>} : memref<8x128xf32, #tpu.memory_space<vmem>>, vector<8x128xf32>,
    return
  }
  func.func @transform_0(%arg0: i32) -> (i32, i32) {
    %c0_i32 = arith.constant 0 : i32
    %c0_i32_0 = arith.constant 0 : i32
    return %arg0, %c0_i32 : i32, i32
  }
  func.func @transform_1(%arg0: i32) -> (i32, i32) {
    %c0_i32 = arith.constant 0 : i32
    %c0_i32_0 = arith.constant 0 : i32
    %c0_i32_1 = arith.constant 0 : i32
    return %c0_i32, %c0_i32_0 : i32, i32
  }
  func.func @transform_2(%arg0: i32) -> (i32, i32) {
    %c0_i32 = arith.constant 0 : i32
    %c0_i32_0 = arith.constant 0 : i32
    %c0_i32_1 = arith.constant 0 : i32
    return %c0_i32, %c0_i32_0 : i32, i32
  }
  func.func @transform_3(%arg0: i32) -> (i32, i32) {
    %c0_i32 = arith.constant 0 : i32
    %c0_i32_0 = arith.constant 0 : i32
    %c0_i32_1 = arith.constant 0 : i32
    return %c0_i32, %c0_i32_0 : i32, i32
  }
  func.func @transform_4(%arg0: i32) -> (i32, i32) {
    %c0_i32 = arith.constant 0 : i32
    %c0_i32_0 = arith.constant 0 : i32
    %c0_i32_1 = arith.constant 0 : i32
    return %c0_i32, %c0_i32_0 : i32, i32
  }
  func.func @transform_5(%arg0: i32) -> (i32, i32) {
    %c0_i32 = arith.constant 0 : i32
    %c0_i32_0 = arith.constant 0 : i32
    %c0_i32_1 = arith.constant 0 : i32
    return %c0_i32, %c0_i32_0 : i32, i32
  }
  func.func @transform_6(%arg0: i32) -> (i32, i32) {
    %c0_i32 = arith.constant 0 : i32
    %c0_i32_0 = arith.constant 0 : i32
    %c0_i32_1 = arith.constant 0 : i32
    return %c0_i32, %c0_i32_0 : i32, i32
  }
  func.func @transform_7(%arg0: i32) -> (i32, i32) {
    %c0_i32 = arith.constant 0 : i32
    %c0_i32_0 = arith.constant 0 : i32
    %c0_i32_1 = arith.constant 0 : i32
    return %c0_i32, %c0_i32_0 : i32, i32
  }
  func.func @transform_8(%arg0: i32) -> (i32, i32) {
    %c0_i32 = arith.constant 0 : i32
    %c0_i32_0 = arith.constant 0 : i32
    %c0_i32_1 = arith.constant 0 : i32
    return %c0_i32, %c0_i32_0 : i32, i32
  }
  func.func @transform_9(%arg0: i32) -> (i32, i32) {
    %c0_i32 = arith.constant 0 : i32
    %c0_i32_0 = arith.constant 0 : i32
    %c0_i32_1 = arith.constant 0 : i32
    return %c0_i32, %c0_i32_0 : i32, i32
  }
  func.func @transform_10(%arg0: i32) -> (i32, i32) {
    %c0_i32 = arith.constant 0 : i32
    %c0_i32_0 = arith.constant 0 : i32
    %c0_i32_1 = arith.constant 0 : i32
    return %c0_i32, %c0_i32_0 : i32, i32
  }
  func.func @transform_11(%arg0: i32) -> (i32, i32) {
    %c0_i32 = arith.constant 0 : i32
    %c0_i32_0 = arith.constant 0 : i32
    return %arg0, %c0_i32 : i32, i32
  }
}

</mosaic_0001>

<bundles_post_ra>
// kernel: sequential_execution_agent_forward.1
= control target key start
LH: loop header
LB: loop body
LE: loop exit
PB: predicated region body
PF: predicated region fallthrough
CT: control target
= control target key end

     0   :  { %v556_v0 = vmov 0.0   ;;  %vm557_vm0 = vmmov 0   ;;  %vm146_vm1 = vcmask 261120   ;;  %v558_v53 = vmov 0   ;;  %s768_s1 = inlined_call_operand.vmem [shape: f32[128,32], index: 1, kind: input, shape index: {}]   ;;  %s769_s3 = inlined_call_operand.vmem [shape: f32[32,32], index: 3, kind: input, shape index: {}]   ;;  %s770_s0 = inlined_call_operand.vmem [shape: f32[8,128], index: 0, kind: input, shape index: {}]   ;;  %s771_s2 = inlined_call_operand.vmem [shape: f32[1,32], index: 2, kind: input, shape index: {}]   ;;  %s772_s5 = inlined_call_operand.vmem [shape: f32[32,32], index: 5, kind: input, shape index: {}]   ;;  %s773_s4 = inlined_call_operand.vmem [shape: f32[1,32], index: 4, kind: input, shape index: {}]   ;;  %s774_s7 = inlined_call_operand.vmem [shape: f32[32,128], index: 7, kind: input, shape index: {}]   ;;  %s775_s6 = inlined_call_operand.vmem [shape: f32[1,32], index: 6, kind: input, shape index: {}]   ;;  %s776_s10 = inlined_call_operand.<no memory space> [shape: f32[1,1], index: 10, kind: input, shape index: {}]   ;;  %s777_s8 = inlined_call_operand.vmem [shape: f32[1,128], index: 8, kind: input, shape index: {}]   ;;  %s778_s9 = inlined_call_operand.vmem [shape: f32[1,128], index: 9, kind: input, shape index: {}]   ;;  %s779_s11 = inlined_call_operand.vmem [shape: f32[8,128], index: 11, kind: output, shape index: {}]  }
   0x1   :  { %480 = vmatprep.subr.mxu0 %v556_v0  ;;  %v56_v1 = vld [vmem:[%s768_s1 + $0x78] sm:$0xff]  ;;  %v55_v2 = vld [vmem:[%s768_s1 + $0x70] sm:$0xff]  ;;  %512 = vmatprep.mubr.msk.f32.mxu0 %vm557_vm0, %v556_v0  ;;  %v54_v3 = vld [vmem:[%s768_s1 + $0x68] sm:$0xff]  ;;  %v16_v45 = vstv %s776_s10  ;;  %v415_v61 = vlaneseq }
   0x2   :  { %481 = vmatpush3.msra.mxu0 %v56_v1  ;;  %515 = vmatprep.subr.mxu1 %v556_v0  ;;  %v53_v4 = vld [vmem:[%s768_s1 + $0x60] sm:$0xff]  ;;  %v138_v5 = vld [vmem:[%s769_s3 + $0x18] sm:$0xff]  ;;  %v51_v7 = vld [vmem:[%s768_s1 + $0x50] sm:$0xff]  ;;  %17 = vst [vmem:[#allocation2] sm:$0x1] %v16_v45 }
   0x3   :  { %482 = vmatprep.subr.mxu0 %v556_v0  ;;  %523 = vmatprep.mubr.msk.f32.mxu1 %vm557_vm0, %v556_v0  ;;  %v52_v6 = vld [vmem:[%s768_s1 + $0x58] sm:$0xff]  ;;  %v50_v8 = vld [vmem:[%s768_s1 + $0x48] sm:$0xff]  ;;  %v49_v9 = vld [vmem:[%s768_s1 + $0x40] sm:$0xff]  ;;  %v416_v62 = vand.u32 127, %v415_v61 }
   0x4   :  { %483 = vmatpush3.msra.mxu0 %v55_v2  ;;  %516 = vmatpush3.msra.mxu1 %v138_v5  ;;  %v48_v10 = vld [vmem:[%s768_s1 + $0x38] sm:$0xff]  ;;  %v47_v11 = vld [vmem:[%s768_s1 + $0x30] sm:$0xff]  ;;  %v46_v12 = vld [vmem:[%s768_s1 + $0x28] sm:$0xff] }
   0x5   :  { %484 = vmatprep.subr.mxu0 %v556_v0  ;;  %517 = vmatprep.subr.mxu1 %v556_v0  ;;  %v45_v13 = vld [vmem:[%s768_s1 + $0x20] sm:$0xff]  ;;  %v44_v14 = vld [vmem:[%s768_s1 + $0x18] sm:$0xff]  ;;  %v43_v15 = vld [vmem:[%s768_s1 + $0x10] sm:$0xff]  ;;  %vm417_vm2 = vcmp.lt.s32.totalorder %v416_v62, 8  ;;  %vm420_vm3 = vcmp.eq.s32.totalorder %v416_v62, 8 }
   0x6   :  { %485 = vmatpush3.msra.mxu0 %v54_v3  ;;  %v42_v16 = vld [vmem:[%s768_s1 + $0x8] sm:$0xff]  ;;  %v41_v17 = vld [vmem:[%s768_s1] sm:$0xff]  ;;  %v137_v19 = vld [vmem:[%s769_s3 + $0x10] sm:$0xff]  ;;  %551 = vset.pattern.permute.xlu0 %v558_v53  ;;  %v446_v63 = vsel %vm417_vm2, 1.0, %v556_v0  ;;  %v447_v1 = vsel %vm420_vm3, 1.0, %v556_v0 }
   0x7   :  { %486 = vmatprep.subr.mxu0 %v556_v0  ;;  %v40_v18 = vld [vmem:[%s770_s0] sm:$0xff]  ;;  %518 = vmatpush3.msra.mxu1 %v137_v19  ;;  %v136_v20 = vld [vmem:[%s769_s3 + $0x8] sm:$0xff]  ;;  %v224_v27 = vld [vmem:[%s772_s5 + $0x18] sm:$0xff] }
   0x8   :  { %487 = vmatpush3.msra.mxu0 %v53_v4  ;;  %519 = vmatprep.subr.mxu1 %v556_v0  ;;  %v135_v21 = vld [vmem:[%s769_s3] sm:$0xff]  ;;  %v223_v28 = vld [vmem:[%s772_s5 + $0x10] sm:$0xff]  ;;  %v222_v29 = vld [vmem:[%s772_s5 + $0x8] sm:$0xff] }
   0x9   :  { %488 = vmatprep.subr.mxu0 %v556_v0  ;;  %520 = vmatpush3.msra.mxu1 %v136_v20  ;;  %v436_v22 = vld [vmem:[%s771_s2] ss:$0 sm:$0xff]  ;;  %v309_v36 = vld [vmem:[%s774_s7 + $0x18] sm:$0xff]  ;;  %v308_v37 = vld [vmem:[%s774_s7 + $0x10] sm:$0xff] }
   0xa   :  { %489 = vmatpush3.msra.mxu0 %v52_v6  ;;  %521 = vmatprep.subr.mxu1 %v556_v0  ;;  %v221_v30 = vld [vmem:[%s772_s5] sm:$0xff]  ;;  %v307_v38 = vld [vmem:[%s774_s7 + $0x8] sm:$0xff] }
   0xb   :  { %490 = vmatprep.subr.mxu0 %v556_v0  ;;  %522 = vmatpush3.msra.mxu1 %v135_v21  ;;  %v437_v31 = vld [vmem:[%s773_s4] ss:$0 sm:$0xff] }
   0xc   :  { %491 = vmatpush3.msra.mxu0 %v51_v7  ;;  %526 = vmatprep.subr.mxu1 %v556_v0  ;;  %v306_v39 = vld [vmem:[%s774_s7] sm:$0xff] }
   0xd   :  { %492 = vmatprep.subr.mxu0 %v556_v0  ;;  %v439_v40 = vld [vmem:[%s775_s6] ss:$0 sm:$0xff] }
   0xe   :  { %493 = vmatpush3.msra.mxu0 %v50_v8  ;;  %v441_v46 = vld [vmem:[%s777_s8] ss:$0 sm:$0xff] }
   0xf   :  { %494 = vmatprep.subr.mxu0 %v556_v0  ;;  %v443_v50 = vld [vmem:[%s778_s9] ss:$0 sm:$0xff] }
  0x10   :  { %495 = vmatpush3.msra.mxu0 %v49_v9  ;;  %v444_v54 = vld [vmem:[#allocation2] ss:$0 sm:$0xff] }
  0x11   :  { %496 = vmatprep.subr.mxu0 %v556_v0 }
  0x12   :  { %497 = vmatpush3.msra.mxu0 %v48_v10 }
  0x13   :  { %498 = vmatprep.subr.mxu0 %v556_v0 }
  0x14   :  { %499 = vmatpush3.msra.mxu0 %v47_v11 }
  0x15   :  { %500 = vmatprep.subr.mxu0 %v556_v0 }
  0x16   :  { %501 = vmatpush3.msra.mxu0 %v46_v12 }
  0x17   :  { %502 = vmatprep.subr.mxu0 %v556_v0 }
  0x18   :  { %503 = vmatpush3.msra.mxu0 %v45_v13 }
  0x19   :  { %504 = vmatprep.subr.mxu0 %v556_v0 }
  0x1a   :  { %505 = vmatpush3.msra.mxu0 %v44_v14 }
  0x1b   :  { %506 = vmatprep.subr.mxu0 %v556_v0 }
  0x1c   :  { %507 = vmatpush3.msra.mxu0 %v43_v15 }
  0x1d   :  { %508 = vmatprep.subr.mxu0 %v556_v0 }
  0x1e   :  { %509 = vmatpush3.msra.mxu0 %v42_v16 }
  0x1f   :  { %510 = vmatprep.subr.mxu0 %v556_v0 }
  0x20   :  { %511 = vmatpush3.msra.mxu0 %v41_v17 }
  0x21   :  { %513 = vmatmul.mubr.f32.vlgmr.msra.gmra.mxu0 %v40_v18 }
  0xe1   :  { %v130_v23 = vpop.f32.mrf.mxu0 }
  0xe2   :  { %v131_v24 = vadd.f32 %v436_v22, %v130_v23 }
  0xe3   :  { %v514_v25 = vpop.f32.mrf.mxu0 }
  0xe4   :  { %v134_v26 = vmax.f32 %v131_v24, 0.0 }
  0xe6   :  { %524 = vmatmul.mubr.msk.f32.vlgmr.msra.gmra.mxu1 %vm146_vm1, %v134_v26 }
  0xe7   :  { %527 = vmatpush3.msra.mxu1 %v224_v27  ;;  %534 = vmatprep.mubr.msk.f32.mxu1 %vm557_vm0, %v556_v0 }
  0xe8   :  { %528 = vmatprep.subr.mxu1 %v556_v0 }
  0xe9   :  { %529 = vmatpush3.msra.mxu1 %v223_v28 }
  0xea   :  { %530 = vmatprep.subr.mxu1 %v556_v0 }
  0xeb   :  { %531 = vmatpush3.msra.mxu1 %v222_v29 }
  0xec   :  { %532 = vmatprep.subr.mxu1 %v556_v0 }
  0xed   :  { %533 = vmatpush3.msra.mxu1 %v221_v30 }
  0xee   :  { %537 = vmatprep.subr.mxu1 %v556_v0 }
 0x1a6   :  { %v216_v32 = vpop.f32.mrf.mxu1 }
 0x1a7   :  { %v217_v33 = vadd.f32 %v437_v31, %v216_v32 }
 0x1a8   :  { %v525_v34 = vpop.f32.mrf.mxu1 }
 0x1a9   :  { %v220_v35 = vmax.f32 %v217_v33, 0.0 }
 0x1ab   :  { %535 = vmatmul.mubr.msk.f32.vlgmr.msra.gmra.mxu1 %vm146_vm1, %v220_v35 }
 0x1ac   :  { %538 = vmatpush3.msra.mxu1 %v309_v36  ;;  %545 = vmatprep.mubr.msk.f32.mxu1 %vm557_vm0, %v556_v0 }
 0x1ad   :  { %539 = vmatprep.subr.mxu1 %v556_v0 }
 0x1ae   :  { %540 = vmatpush3.msra.mxu1 %v308_v37 }
 0x1af   :  { %541 = vmatprep.subr.mxu1 %v556_v0 }
 0x1b0   :  { %542 = vmatpush3.msra.mxu1 %v307_v38 }
 0x1b1   :  { %543 = vmatprep.subr.mxu1 %v556_v0 }
 0x1b2   :  { %544 = vmatpush3.msra.mxu1 %v306_v39 }
 0x26b   :  { %v301_v41 = vpop.f32.mrf.mxu1 }
 0x26c   :  { %v302_v42 = vadd.f32 %v439_v40, %v301_v41 }
 0x26d   :  { %v536_v43 = vpop.f32.mrf.mxu1 }
 0x26e   :  { %v305_v44 = vmax.f32 %v302_v42, 0.0 }
 0x270   :  { %546 = vmatmul.mubr.msk.f32.vlgmr.msra.gmra.mxu1 %vm146_vm1, %v305_v44 }
 0x330   :  { %v386_v47 = vpop.f32.mrf.mxu1 }
 0x331   :  { %v387_v48 = vadd.f32 %v441_v46, %v386_v47 }
 0x332   :  { %v547_v49 = vpop.f32.mrf.mxu1 }
 0x333   :  { %v390_v51 = vmax.f32 %v387_v48, 0.0  ;;  %v423_v3 = vmul.f32 %v446_v63, %v387_v48 }
 0x335   :  { %v398_v52 = vmul.f32 %v443_v50, %v390_v51 }
 0x337   :  { %399 = vadd.xlane.f32.xlu0 %v398_v52 }
 0x3c0   :  { %v400_v55 = vpop.xlane.xlu0 %399 }
 0x3c1   :  { %v408_v56 = vadd.f32 %v444_v54, %v400_v55 }
 0x3c3   :  { %v445_v57 = vmul.f32 -1.442695, %v408_v56 }
 0x3c5   :  { %552 = vpow2.f32 %v445_v57 }
 0x3d2   :  { %v553_v58 = vpop.eup %552 }
 0x3d3   :  { %v412_v59 = vadd.f32 1.0, %v553_v58 }
 0x3d5   :  { %554 = vrcp.f32 %v412_v59 }
 0x3e2   :  { %v555_v60 = vpop.eup %554 }
 0x3e3   :  { %426 = vperm.xlu0 %551, %v555_v60  }
 0x45e   :  { %v427_v2 = vpop.permute.xlu0 %426 }
 0x45f   :  { %v429_v4 = vmul.f32 %v447_v1, %v427_v2 }
 0x461   :  { %v430_v5 = vadd.f32 %v429_v4, %v423_v3 }
 0x463   :  { %431 = vst [vmem:[%s779_s11] sm:$0xff] %v430_v5 }

</bundles_post_ra>
